<compile_context>
chip_gen: v6e
topology: v6e:2x2x1
jax: 0.10.0
libtpu: 0.0.40
codegen_flags: <defaults>
</compile_context>

<pallas_src>
import jax
import jax.numpy as jnp
from jax.experimental import pallas as pl
from jax.experimental.pallas import tpu as pltpu


def _round_up(x, m):
    return (x + m - 1) // m * m


def _vmem_capacity_bytes():
    try:
        info = pltpu.get_tpu_info()
        cap = getattr(info, "vmem_capacity_bytes", None)
        if cap:
            return int(cap)
    except Exception:
        pass
    return 64 << 20  # conservative fallback (v7x per-TensorCore VMEM)


def _pick_tile(hw, c, itemsize, vmem_cap):
    """Spatial (lane) tile length: multiple of 128, sized per TPU generation."""
    if hw <= 128:
        return hw  # single full-extent block
    # Per-step working set ~= 3*C*t*itemsize (input tile + both output halves);
    # double buffering doubles it.  Target ~24 MiB/step on 128 MiB VMEM parts
    # (v5e/v6e -> t~2048 for C=1024 f32) and ~12 MiB/step on 64 MiB parts
    # (v7x -> t~1024), leaving headroom for the tiny g column + compiler scratch.
    per_step_budget = (12 << 20) if vmem_cap <= (80 << 20) else (24 << 20)
    t = per_step_budget // (3 * max(c, 8) * itemsize)
    t = max(128, min((t // 128) * 128, 8192))
    return min(t, _round_up(hw, 128))


def _orthogonal_fusion_kernel(inv_ref, g_ref, l_ref, o_ref):
    # inv_ref: (B,) f32 in SMEM (scalar prefetch) -> 1 / (||g||_2 + 1e-6)^2
    # g_ref:   (1, C, 1)   un-normalized global feature column (input dtype)
    # l_ref:   (1, C, T)   spatial tile of the flattened local feature map
    # o_ref:   (1, 2, C, T): [0] broadcast global half, [1] orthogonal component
    b = pl.program_id(1)
    inv = inv_ref[b]
    g = g_ref[0]                                   # (C, 1)
    l = l_ref[0]                                   # (C, T)
    g32 = g.astype(jnp.float32)
    l32 = l.astype(jnp.float32)
    # Per-column projection coefficient via a sublane (XLU) reduce + VPU
    # broadcast-multiply (no degenerate M=1 MXU matmul).  Both 1/||g|| factors
    # are folded into the prefetched f32 scalar, so low-precision inputs keep
    # an f32 projection path; cast only at the final stores.
    proj_row = jnp.sum(g32 * l32, axis=0, keepdims=True) * inv    # (1, T)
    orth = l32 - g32 * proj_row                                   # (C, T)
    o_ref[0, 0, :, :] = jnp.broadcast_to(g.astype(o_ref.dtype), l.shape)
    o_ref[0, 1, :, :] = orth.astype(o_ref.dtype)


def orthogonal_fusion(local_feat, global_feat, projector_key=None):
    """Pallas implementation of OrthogonalFusion.forward.

    local_feat:  (B, C_local, H, W)
    global_feat: (B, C_global)
    Returns:     (B, 2*C_local, H, W)
    """
    B, C, H, W = local_feat.shape
    Bg, Cg = global_feat.shape
    assert B == Bg, "Batch size mismatch between local and global features"

    if Cg != C:
        # TODO(synk): PyTorch's lazily-created nn.Linear projector is freshly
        # random-initialized here (fixed key); matches shapes/semantics but not
        # a trained checkpoint's weights.
        key = projector_key if projector_key is not None else jax.random.PRNGKey(42)
        kw, kb = jax.random.split(key)
        bound = 1.0 / jnp.sqrt(jnp.float32(Cg))
        w = jax.random.uniform(kw, (C, Cg), jnp.float32, -bound, bound)
        bias = jax.random.uniform(kb, (C,), jnp.float32, -bound, bound)
        global_feat = global_feat @ w.T + bias

    dtype = local_feat.dtype
    itemsize = jnp.dtype(dtype).itemsize
    HW = H * W

    # Hoisted normalization: one tiny per-batch f32 scalar instead of a second
    # per-batch column input.  orth = l - g * inv_norm_sq * (g . l).
    gf32 = global_feat.astype(jnp.float32)
    norm = jnp.sqrt(jnp.sum(gf32 * gf32, axis=1)) + 1e-6           # (B,)
    inv_norm_sq = (1.0 / (norm * norm)).astype(jnp.float32)        # (B,)

    g_col = global_feat.astype(dtype)[..., None]                   # (B, C, 1)
    local_flat = local_feat.reshape(B, C, HW)                      # free view

    vmem_cap = _vmem_capacity_bytes()
    t_hw = _pick_tile(HW, C, itemsize, vmem_cap)
    n_tiles = pl.cdiv(HW, t_hw)

    # VMEM limit from the real working set: double-buffered tiles (input +
    # both output halves) + physical (C,1) column buffers (padded to 128
    # lanes) + a few MiB of compiler headroom, capped below physical VMEM.
    per_step = 3 * C * t_hw * itemsize
    col_phys = _round_up(max(C, 8), 8) * 128 * itemsize
    vmem_bytes = 2 * per_step + 2 * col_phys + (4 << 20)
    vmem_bytes = int(min(max(vmem_bytes, 16 << 20), vmem_cap - (6 << 20)))

    out = pl.pallas_call(
        _orthogonal_fusion_kernel,
        out_shape=jax.ShapeDtypeStruct((B, 2, C, HW), dtype),
        grid_spec=pltpu.PrefetchScalarGridSpec(
            num_scalar_prefetch=1,
            # Spatial axis first so the axis with many iterations is the one a
            # dual-TensorCore part (v7x) splits across cores even when B == 1.
            grid=(n_tiles, B),
            in_specs=[
                pl.BlockSpec((1, C, 1), lambda s, b, inv: (b, 0, 0)),      # g column
                pl.BlockSpec((1, C, t_hw), lambda s, b, inv: (b, 0, s)),   # local tile
            ],
            out_specs=pl.BlockSpec((1, 2, C, t_hw), lambda s, b, inv: (b, 0, 0, s)),
        ),
        compiler_params=pltpu.CompilerParams(
            dimension_semantics=("parallel", "parallel"),
            vmem_limit_bytes=vmem_bytes,
        ),
    )(inv_norm_sq, g_col, local_flat)

    # (B, 2, C, HW) -> (B, 2C, H, W): exact layout of
    # torch.cat([global_map, orthogonal_comp], dim=1); free reshape, no slice.
    return out.reshape(B, 2 * C, H, W)


def _reference_fusion(local_feat, global_feat):
    # Pure-JAX reference mirroring the PyTorch forward (C_global == C_local case).
    B, C, H, W = local_feat.shape
    norm = jnp.linalg.norm(global_feat, axis=1, keepdims=True) + 1e-6
    unit = global_feat / norm
    lf = local_feat.reshape(B, C, H * W)
    proj = jnp.einsum("bc,bcs->bs", unit, lf)
    proj = jnp.einsum("bc,bs->bcs", unit, proj)
    orth = lf - proj
    gmap = jnp.broadcast_to(global_feat[:, :, None], (B, C, H * W))
    return jnp.concatenate([gmap, orth], axis=1).reshape(B, 2 * C, H, W)


if __name__ == "__main__":
    key = jax.random.PRNGKey(0)
    k1, k2 = jax.random.split(key)

    B, C, H, W = 2, 4, 16, 16
    local_feat = jax.random.normal(k1, (B, C, H, W), jnp.float32)
    global_feat = jax.random.normal(k2, (B, C), jnp.float32)  # C_global == C_local -> no projector

    out = orthogonal_fusion(local_feat, global_feat)
    out = jax.block_until_ready(out)

    ref = _reference_fusion(local_feat, global_feat)
    assert out.shape == (B, 2 * C, H, W), out.shape
    assert jnp.allclose(out, ref, atol=1e-5, rtol=1e-5), "mismatch vs reference"

    print("KERNEL_OK")
</pallas_src>

<mosaic_0001>
module attributes {stable_mosaic.version = 11 : i64} {
  func.func @_orthogonal_fusion_kernel(%arg0: i32, %arg1: i32, %arg2: memref<2xf32, #tpu.memory_space<smem>>, %arg3: memref<1x4x1xf32, #tpu.memory_space<vmem>>, %arg4: memref<1x4x256xf32, #tpu.memory_space<vmem>>, %arg5: memref<1x2x4x256xf32, #tpu.memory_space<vmem>>) attributes {dimension_semantics = [#tpu.dimension_semantics<parallel>, #tpu.dimension_semantics<parallel>], iteration_bounds = array<i64: 1, 2>, scalar_prefetch = 1 : i64, scratch_operands = 0 : i64, tpu.core_type = #tpu.core_type<tc>, window_params = [{transform_indices = @transform_0, window_bounds = array<i64: 1, 4, 1>}, {transform_indices = @transform_1, window_bounds = array<i64: 1, 4, 256>}, {transform_indices = @transform_2, window_bounds = array<i64: 1, 2, 4, 256>}]} {
    %0 = arith.index_cast %arg1 : i32 to index
    %1 = memref.load %arg2[%0] : memref<2xf32, #tpu.memory_space<smem>>
    %c0 = arith.constant 0 : index
    %c0_0 = arith.constant 0 : index
    %c0_1 = arith.constant 0 : index
    %2 = vector.load %arg3[%c0, %c0_0, %c0_1] : memref<1x4x1xf32, #tpu.memory_space<vmem>>, vector<1x4x1xf32>
    %3 = vector.shape_cast %2 : vector<1x4x1xf32> to vector<4x1xf32>
    %c0_2 = arith.constant 0 : index
    %c0_3 = arith.constant 0 : index
    %c0_4 = arith.constant 0 : index
    %4 = vector.load %arg4[%c0_2, %c0_3, %c0_4] : memref<1x4x256xf32, #tpu.memory_space<vmem>>, vector<1x4x256xf32>
    %5 = vector.shape_cast %4 : vector<1x4x256xf32> to vector<4x256xf32>
    %6 = vector.broadcast %3 : vector<4x1xf32> to vector<4x256xf32>
    %7 = arith.mulf %6, %5 : vector<4x256xf32>
    %cst = arith.constant dense<0.000000e+00> : vector<256xf32>
    %8 = vector.multi_reduction <add>, %7, %cst [0] : vector<4x256xf32> to vector<256xf32>
    %9 = vector.shape_cast %8 : vector<256xf32> to vector<1x256xf32>
    %10 = vector.broadcast %1 : f32 to vector<1x256xf32>
    %11 = arith.mulf %9, %10 : vector<1x256xf32>
    %12 = vector.broadcast %3 : vector<4x1xf32> to vector<4x256xf32>
    %13 = vector.broadcast %11 : vector<1x256xf32> to vector<4x256xf32>
    %14 = arith.mulf %12, %13 : vector<4x256xf32>
    %15 = arith.subf %5, %14 : vector<4x256xf32>
    %16 = vector.shape_cast %3 : vector<4x1xf32> to vector<4x1xf32>
    %17 = vector.broadcast %16 : vector<4x1xf32> to vector<4x256xf32>
    %c0_5 = arith.constant 0 : index
    %c0_6 = arith.constant 0 : index
    %c0_7 = arith.constant 0 : index
    %c0_8 = arith.constant 0 : index
    %18 = vector.load %arg5[%c0_5, %c0_6, %c0_7, %c0_8] : memref<1x2x4x256xf32, #tpu.memory_space<vmem>>, vector<1x1x4x256xf32>
    %19 = vector.shape_cast %18 : vector<1x1x4x256xf32> to vector<4x256xf32>
    %20 = vector.shape_cast %17 : vector<4x256xf32> to vector<1x1x4x256xf32>
    tpu.vector_store %arg5[%c0_5, %c0_6, %c0_7, %c0_8], %20 {strides = array<i32>} : memref<1x2x4x256xf32, #tpu.memory_space<vmem>>, vector<1x1x4x256xf32>,
    %c0_9 = arith.constant 0 : index
    %c1 = arith.constant 1 : index
    %c0_10 = arith.constant 0 : index
    %c0_11 = arith.constant 0 : index
    %21 = vector.load %arg5[%c0_9, %c1, %c0_10, %c0_11] : memref<1x2x4x256xf32, #tpu.memory_space<vmem>>, vector<1x1x4x256xf32>
    %22 = vector.shape_cast %21 : vector<1x1x4x256xf32> to vector<4x256xf32>
    %23 = vector.shape_cast %15 : vector<4x256xf32> to vector<1x1x4x256xf32>
    tpu.vector_store %arg5[%c0_9, %c1, %c0_10, %c0_11], %23 {strides = array<i32>} : memref<1x2x4x256xf32, #tpu.memory_space<vmem>>, vector<1x1x4x256xf32>,
    return
  }
  func.func @transform_0(%arg0: i32, %arg1: i32, %arg2: memref<2xf32, #tpu.memory_space<smem>>) -> (i32, i32, i32) {
    %c0_i32 = arith.constant 0 : i32
    %c0_i32_0 = arith.constant 0 : i32
    %c0_i32_1 = arith.constant 0 : i32
    return %arg1, %c0_i32, %c0_i32_0 : i32, i32, i32
  }
  func.func @transform_1(%arg0: i32, %arg1: i32, %arg2: memref<2xf32, #tpu.memory_space<smem>>) -> (i32, i32, i32) {
    %c0_i32 = arith.constant 0 : i32
    %c0_i32_0 = arith.constant 0 : i32
    return %arg1, %c0_i32, %arg0 : i32, i32, i32
  }
  func.func @transform_2(%arg0: i32, %arg1: i32, %arg2: memref<2xf32, #tpu.memory_space<smem>>) -> (i32, i32, i32, i32) {
    %c0_i32 = arith.constant 0 : i32
    %c0_i32_0 = arith.constant 0 : i32
    %c0_i32_1 = arith.constant 0 : i32
    return %arg1, %c0_i32, %c0_i32_0, %arg0 : i32, i32, i32, i32
  }
}

</mosaic_0001>

<bundles_post_ra>
// kernel: tpu_custom_call.1
= control target key start
LH: loop header
LB: loop body
LE: loop exit
PB: predicated region body
PF: predicated region fallthrough
CT: control target
= control target key end

     0   :  { %s765_s0 = inlined_call_operand.vmem [shape: f32[2], index: 0, kind: input, shape index: {}]   ;;  %s766_s1 = inlined_call_operand.vmem [shape: f32[2,4,1], index: 1, kind: input, shape index: {}]   ;;  %s767_s2 = inlined_call_operand.hbm [shape: f32[2,4,256], index: 2, kind: input, shape index: {}]   ;;  %s768_s3 = inlined_call_operand.hbm [shape: f32[2,2,4,256], index: 3, kind: output, shape index: {}]  }
   0x1   :  { %s8_s14 = sshll.u32 %s765_s0, 4  ;;  %s9_s14 = int_to_ptr.vmem [resolvable:$true] %s8_s14 }
   0x2   :  { %s456_s15 = scalar_lea.vmem %s9_s14, 16  ;;  %p461_p1 = scmp.lt.s32.totalorder %s9_s14, %s9_s14 }
   0x3   :  { %p457_p0 = scmp.ne.s32.totalorder %s9_s14, %s456_s15  ;;  %p462_p2 = scmp.lt.s32.totalorder %s456_s15, %s456_s15 }
   0x5   :  { %p463_p3 = por %p462_p2, %p461_p1 }
   0x7   :  { %p464_p4 = pnand %p463_p3, %p457_p0 }
   0x9   :  { %467 = shalt.err (!%p464_p4)  }
   0xa   :  { %s580_s16 = smov [#allocation3]  }
   0xb   :  { %11 = dma.vmem_to_smem %s9_s14, 16, %s580_s16, [#allocation2] }
   0xc   :  { %546 = dma.done.wait [#allocation2], 16 }
   0xd   :  { %547 = vsyncadd [#allocation2], 4294967280 }
   0xe   :  { %13 = sfence }
   0xf   :  { %14 = vsyncpa [#allocation5], 0 }
  0x10   :  { %16 = vsyncpa [#allocation5 + $0x1], 0 }
  0x11   :  { %17 = vsyncpa [#allocation6], 0 }
  0x12   :  { %19 = vsyncpa [#allocation6 + $0x1], 0  ;;  %s610_s17 = smov 0   ;;  %s612_s0 = smov 0  }
  0x13   :  { %s614_s18 = smov 0   ;;  %s616_s19 = smov 0  }
  0x14   :  { %s618_s20 = smov 0   ;;  %s620_s21 = smov 0  }
  0x15 LB: > { %s368_s22 = sadd.s32 4294967295, %s578_s21   ;;  %s369_s23 = sadd.s32 4294967294, %s578_s21   ;;  %s578_s21 = sphi %s620_s21, %s25_s21   ;;  %s574_s20 = sphi %s618_s20, %s780_s20   ;;  %s570_s19 = sphi %s616_s19, %s779_s19   ;;  %s566_s18 = sphi %s614_s18, %s778_s18   ;;  %s562_s0 = sphi %s612_s0, %s777_s0   ;;  %s558_s17 = sphi %s610_s17, %s776_s17  }
  0x16   : > { %s34_s24 = sadd.s32 1, %s574_s20  ;;  %s72_s25 = sadd.s32 1, %s566_s18 }
  0x17   : > { %p35_p5 = scmp.ge.s32.totalorder %s34_s24, 2  ;;  %p79_p6 = scmp.ne.s32.totalorder %s566_s18, %s562_s0 }
  0x18   : > { %p80_p7 = scmp.eq.s32.totalorder %s578_s21, 0  ;;  %p85_p8 = scmp.ne.s32.totalorder %s562_s0, %s558_s17 }
  0x19   : > { %s782_s24 = smov (%p35_p5, %s34_s24), 0  ;;  %p86_p10 = scmp.eq.s32.totalorder %s368_s22, 0 }
  0x1a   : > { %p651_p9 = por %p80_p7, %p79_p6  ;;  %s67_s27 = ssub.s32 %s574_s20, %s782_s24 }
  0x1b   : > { %p111_p11 = scmp.eq.s32.totalorder %s368_s22, 1  ;;  %p70_p12 = scmp.eq.s32.totalorder %s67_s27, 0 }
  0x1c   : > { %p657_p13 = por %p86_p10, %p85_p8  ;;  %p117_p1 = scmp.eq.s32.totalorder %s369_s23, 1 }
  0x1d   : > { %p661_p0 = por %p111_p11, %p79_p6  ;;  %p399_p4 = scmp.lt.s32.totalorder %s578_s21, 2 }
  0x1e   : > { %s666_s30 = scalar_select %p70_p12, %s566_s18, %s72_s25  }
  0x1f   : > { %p668_p2 = por %p117_p1, %p85_p8  ;;  %s144_s5 = sand.u32 1, %s566_s18  }
  0x20   : > { %s372_s6 = sshll.u32 %s144_s5, 3  ;;  %s385_s7 = sshll.u32 %s574_s20, 7 }
  0x21   : > { %s772_s4 = scalar_select %p668_p2, 1, 0 }
  0x22   : > { %s156_s10 = scalar_lea.hbm %s767_s2, %s385_s7  ;;  %s148_s11 = scalar_lea.vmem [#allocation4], %s372_s6 }
  0x23   : > { %s158_s12 = sshll.u32 %s148_s11, 4  ;;  %p681_p5 = pnand %p399_p4, %p651_p9  ;;  %s159_s12 = int_to_ptr.vmem [resolvable:$true] %s158_s12 }
  0x24   : > { %p375_p6 = scmp.ge.s32.totalorder %s578_s21, 1  ;;  %p163_p7 = scmp.lt.s32.totalorder %s578_s21, 3 }
  0x25   : > { %s145_s14 = scalar_lea.sflag [#allocation5], %s144_s5  ;;  %p470_p8 = pneg %p681_p5 }
  0x26   : > { %s481_s15 = scalar_lea.vmem %s159_s12, 128  ;;  %s581_s16 = smov [#allocation4]  }
  0x27   : > { %p482_p10 = scmp.ne.s32.totalorder %s159_s12, %s481_s15  ;;  %s486_s22 = sshll.u32 %s581_s16, 4  ;;  %s487_s22 = int_to_ptr.vmem [resolvable:$false] %s486_s22 }
  0x28   : > { %s488_s23 = scalar_lea.vmem %s487_s22, 256  ;;  %p489_p1 = scmp.lt.s32.totalorder %s159_s12, %s487_s22 }
  0x29   : > { %p484_p11 = pnand %p482_p10, %p470_p8  ;;  %p490_p3 = scmp.lt.s32.totalorder %s488_s23, %s481_s15 }
  0x2b   : > { %p485_p12 = pneg %p484_p11  ;;  %p491_p9 = por %p490_p3, %p489_p1 }
  0x2d   : > { %p492_p4 = pnand %p491_p9, %p485_p12 }
  0x2f   : > { %495 = shalt.err (!%p492_p4)
}
  0x30   : > { %394 = dma.hbm_to_vmem [thread:$0]  (!%p681_p5), %s156_s10, 128, %s159_s12, %s145_s14  }
  0x31   : > { %p164_p2 = pnand %p375_p6, %p163_p7 }
  0x32   : > { %s696_s25 = sand.u32 (!%p164_p2), 1, %s562_s0  }
  0x33   : > { %167 = sbr.rel (%p164_p2) target bundleno = 225 (0xe1), region = 28  ;;  %s376_s26 = sshll.u32 (!%p164_p2), %s696_s25, 3 }
  0x34   : > { %s170_s27 = scalar_lea.sflag (!%p164_p2), [#allocation5], %s696_s25  ;;  %s173_s5 = scalar_lea.vmem (!%p164_p2), [#allocation4], %s376_s26 }
  0x38   : > { %549 = dma.done.wait (%p657_p13), %s170_s27, 128  }
  0x39   : > { %551 = vsyncadd (%p657_p13), %s170_s27, 4294967168  ;;  %p198_p3 = scmp.lt.s32.totalorder %s570_s19, 1  ;;  %v582_v0 = vmov 0   ;;  %v583_v2 = vmov 839922192   ;;  %v245_v4 = vlaneseq  ;;  %v206_v7 = vld [vmem:[%s173_s5] sm:$0xff] }
  0x3a   : > { %454 = vset.pattern.permute.xlu0 %v582_v0  ;;  %v243_v3 = vunpack.c.l.s4 %v583_v2  ;;  %s377_s28 = sshll.u32 %s696_s25, 4  ;;  %v213_v8 = vcombine.high %v206_v7, %v206_v7  ;;  %vm217_vm0 = vcmask 1043456   ;;  %s204_s12 = sld [smem:[#allocation3 + %s570_s19]] }
  0x3b   : > { %s199_s6 = scalar_select %p198_p3, %s570_s19, 1  ;;  %v246_v6 = vshrl.u32 %v245_v4, 7 }
  0x3c   : > { %v244_v5 = vunpack.c.0.s8 %v243_v3  ;;  %s197_s11 = scalar_lea.vmem [#allocation7], %s377_s28  ;;  %s386_s14 = sshll.u32 %s570_s19, 8 }
  0x3d   : > { %s378_s7 = sshll.u32 %s199_s6, 2  ;;  %s269_s13 = sshll.u32 %s197_s11, 4  ;;  %s712_s13 = int_to_ptr.vmem [resolvable:$true] %s269_s13 }
  0x3e   : > { %s201_s10 = scalar_lea.vmem %s766_s1, %s378_s7  ;;  %v247_v9 = vsub.s32 %v244_v5, %v246_v6  ;;  %s717_s22 = scalar_lea.hbm %s768_s3, %s386_s14 }
  0x3f   : > { %v205_v1 = vld [vmem:[%s201_s10] sm:$0xf]  ;;  %s254_s23 = scalar_lea.sflag [#allocation6], %s696_s25  ;;  %s496_s26 = scalar_lea.vmem %s712_s13, 256 }
  0x40   : > { %209 = vperm.xlu0 %454, %v205_v1   ;;  %v232_v26 = vstv %s204_s12  ;;  %p497_p13 = scmp.ne.s32.totalorder %s712_s13, %s496_s26  ;;  %s584_s19 = smov [#allocation7]  }
  0x41   : > { %s500_s27 = sshll.u32 %s584_s19, 4  ;;  %s501_s27 = int_to_ptr.vmem [resolvable:$false] %s500_s27 }
  0x42   : > { %p498_p2 = pnand %p497_p13, %p661_p0  ;;  %s502_s5 = scalar_lea.vmem %s501_s27, 512 }
  0x43   : > { %p503_p6 = scmp.lt.s32.totalorder %s712_s13, %s501_s27  ;;  %p504_p7 = scmp.lt.s32.totalorder %s502_s5, %s496_s26 }
  0x44   : > { %p499_p5 = pneg %p498_p2 }
  0x45   : > { %p505_p8 = por %p504_p7, %p503_p6 }
  0x47   : > { %p506_p10 = pnand %p505_p8, %p499_p5 }
  0xbb   : > { %v210_v10 = vpop.permute.xlu0 %209 }
  0xbc   : > { %v215_v11 = vmul.f32 %v210_v10, %v206_v7  ;;  %v216_v12 = vmul.f32 %v213_v8, %v210_v10  ;;  %v248_v13 = vrot.slane %v210_v10, %v247_v9 }
  0xbe   : > { %v218_v14 = vsel %vm217_vm0, %v215_v11, 0.0  ;;  %v225_v15 = vsel %vm217_vm0, %v216_v12, 0.0  ;;  %250 = vst [vmem:[%s197_s11] sm:$0xff] %v248_v13 }
  0xbf   : > { %v219_v16 = vrot.slane %v218_v14, 4  ;;  %v226_v17 = vrot.slane %v225_v15, 4 }
  0xc1   : > { %v220_v18 = vadd.f32 %v219_v16, %v218_v14  ;;  %v227_v19 = vadd.f32 %v226_v17, %v225_v15 }
  0xc3   : > { %v221_v20 = vrot.slane %v220_v18, 2  ;;  %v228_v21 = vrot.slane %v227_v19, 2 }
  0xc5   : > { %v222_v22 = vadd.f32 %v221_v20, %v220_v18  ;;  %v229_v23 = vadd.f32 %v228_v21, %v227_v19 }
  0xc7   : > { %v223_v24 = vrot.slane %v222_v22, 1  ;;  %v230_v25 = vrot.slane %v229_v23, 1 }
  0xc9   : > { %v224_v27 = vadd.f32 %v223_v24, %v222_v22  ;;  %v231_v28 = vadd.f32 %v230_v25, %v229_v23 }
  0xcb   : > { %v233_v29 = vmul.f32 %v232_v26, %v224_v27  ;;  %v234_v30 = vmul.f32 %v232_v26, %v231_v28 }
  0xcd   : > { %v235_v31 = vmul.f32 %v233_v29, %v210_v10  ;;  %v236_v32 = vmul.f32 %v234_v30, %v210_v10 }
  0xcf   : > { %v239_v33 = vcombine.low %v235_v31, %v236_v32 }
  0xd1   : > { %v241_v34 = vsub.f32 %v206_v7, %v239_v33 }
  0xd3   : > { %379 = vst [vmem:[%s197_s11 + $0x8] sm:$0xff] %v241_v34 }
  0xd4   : > { %509 = shalt.err (!%p506_p10)
}
  0xd5   : > { %s510_s6 = scalar_lea.hbm %s717_s22, 256  ;;  %s514_s9 = scalar_lea.hbm %s768_s3, 512 }
  0xd6   : > { %p511_p11 = scmp.ne.s32.totalorder %s717_s22, %s510_s6  ;;  %p515_p9 = scmp.lt.s32.totalorder %s717_s22, %s768_s3 }
  0xd7   : > { %p516_p4 = scmp.lt.s32.totalorder %s514_s9, %s510_s6 }
  0xd8   : > { %p512_p12 = pnand %p511_p11, %p661_p0 }
  0xd9   : > { %p517_p3 = por %p516_p4, %p515_p9 }
  0xda   : > { %p513_p1 = pneg %p512_p12 }
  0xdc   : > { %p518_p13 = pnand %p517_p3, %p513_p1 }
  0xde   : > { %521 = shalt.err (!%p518_p13)
}
  0xdf   : > { %s585_s11 = smov 128   ;;  %s586_s12 = smov 8  }
  0xe0   : > { %389 = dma.vmem_to_hbm [thread:$0]  (%p661_p0), %s712_s13, 256, %s717_s22, %s254_s23, %s585_s11, %s585_s11, %s586_s12  }
  0xe1 PF: > { %s284_s14 = sand.u32 1, %s558_s17   ;;  %p774_p2 = scmp.ne.s32.totalorder %s772_s4, 0 }
  0xe2   : > { %p775_p5 = scmp.ge.s32.totalorder %s578_s21, 2  ;;  %s285_s15 = scalar_lea.sflag [#allocation6], %s284_s14 }
  0xe4   : > { %p396_p6 = pnand %p775_p5, %p774_p2 }
  0xe6   : > { %p397_p7 = pneg %p396_p6 }
  0xe8   : > { %553 = dma.done.wait (%p397_p7), %s285_s15, 256  }
  0xe9   : > { %555 = vsyncadd (%p397_p7), %s285_s15, 4294967040  ;;  %s25_s21 = sadd.s32 1, %s578_s21   ;;  %s776_s17 = smov %s562_s0 }
  0xea   : > { %p22_p8 = scmp.ge.s32.totalorder %s25_s21, 4   ;;  %s777_s0 = smov %s566_s18 }
  0xeb   : > { %s778_s18 = smov %s666_s30  ;;  %s779_s19 = smov %s574_s20 }
  0xec   : > { %s780_s20 = smov %s782_s24  ;;  %24 = sbr.rel (!%p22_p8) target bundleno = 21 (0x15), region = 77 }
  0xf1   :  { %290 = vsyncpa [#allocation5], 1 }
  0xf2   :  { %292 = vsyncpa [#allocation5 + $0x1], 1 }
  0xf3   :  { %293 = vsyncpa [#allocation6], 1 }
  0xf4   :  { %295 = vsyncpa [#allocation6 + $0x1], 1 }

</bundles_post_ra>
